<compile_context>
chip_gen: v5e
topology: v5e:2x2
jax: 0.10.0
libtpu: 0.0.40
codegen_flags: <defaults>
</compile_context>

<pallas_src>
import functools

import jax
import jax.numpy as jnp
from jax import lax
from jax.experimental import pallas as pl
from jax.experimental.pallas import tpu as pltpu

_LANE = 128
_FUSE_MAX_BYTES = 2 << 20          # only concat-fuse views when the whole group is this small
_MAX_BUDGET = 16 << 20             # upper bound on per-input-buffer bytes
_SUBLANE = {4: 8, 2: 16, 1: 32}    # sublane packing granularity per itemsize


def _round_up(x, m):
    return (x + m - 1) // m * m


def _cdiv(a, b):
    return (a + b - 1) // b


def _tpu_params():
    """(vmem_capacity_bytes, tensorcores_per_chip) with conservative fallbacks."""
    vmem_cap = 64 << 20            # conservative default (v7x per-core VMEM)
    num_cores = 1
    try:
        vmem_cap = int(pltpu.get_tpu_info().vmem_capacity_bytes)
    except Exception:
        pass
    try:
        kind = jax.devices()[0].device_kind.lower()
        # v7x and v4 have 2 TensorCores per chip ("megacore"); v5e/v6e have 1.
        if ("v7" in kind) or ("tpu7" in kind) or ("v4" in kind):
            num_cores = 2
    except Exception:
        pass
    return vmem_cap, num_cores


def _choose_tiles(r, hw, itemsize, budget, num_cores):
    """Pick (tm, thw, sub) for a (r, hw) row-mean problem. thw == hw means full-row tiles."""
    sub = _SUBLANE[itemsize]
    hw_lanes = _round_up(hw, _LANE)

    # Prefer a full-row spatial tile: contiguous DMA, single reduction step.
    if sub * hw_lanes * itemsize <= budget:
        thw = hw
        lanes = hw_lanes
    else:
        # HW too large even for a minimum-height tile: split it into 128-multiple chunks.
        thw = max(_LANE, (budget // (sub * itemsize)) // _LANE * _LANE)
        thw = min(thw, hw_lanes)
        lanes = thw

    # Row tile: largest sublane multiple whose input tile + lane-padded (tm,1) output buffer
    # fit the per-buffer budget.
    per_row_bytes = lanes * itemsize + _LANE * itemsize
    tm = max(sub, (budget // per_row_bytes) // sub * sub)
    tm = min(tm, _round_up(r, sub))

    # Multi-TensorCore chips only: make sure the "parallel" row axis has >= 2 steps so both
    # cores get their own HBM stream.  On single-core chips this would just shrink the tile.
    if num_cores >= 2 and tm >= 2 * sub and _cdiv(r, tm) < 2:
        tm = max(sub, _round_up(_cdiv(r, 2), sub))
    return tm, thw, sub


def _row_mean_full_kernel(x_ref, o_ref, *, inv_hw):
    # Full-row tile: one cross-lane reduce per tile, widened to f32 on the fly.
    s = jnp.sum(x_ref[...], axis=-1, keepdims=True, dtype=jnp.float32)
    o_ref[...] = (s * inv_hw).astype(o_ref.dtype)


def _row_mean_chunked_kernel(x_ref, o_ref, acc_ref, *, hw, thw, inv_hw, mask_tail):
    # Chunked spatial reduction (only for very large HW).  acc_ref is a lane-dense
    # (tm, 128) f32 accumulator: per-step work is pure VPU adds; the single cross-lane
    # reduce happens once in the finalize branch.
    j = pl.program_id(1)

    @pl.when(j == 0)
    def _init():
        acc_ref[...] = jnp.zeros_like(acc_ref)

    x = x_ref[...]
    if mask_tail:
        # The last spatial chunk overruns HW: those lanes hold garbage, select 0 instead.
        lane = lax.broadcasted_iota(jnp.int32, x.shape, dimension=1)
        x = jnp.where(lane < (hw - j * thw), x, jnp.zeros((), x.dtype))

    tm = x.shape[0]
    acc_ref[...] += jnp.sum(x.reshape(tm, thw // _LANE, _LANE), axis=1, dtype=jnp.float32)

    @pl.when(j == pl.num_programs(1) - 1)
    def _finalize():
        s = jnp.sum(acc_ref[...], axis=-1, keepdims=True)
        o_ref[...] = (s * inv_hw).astype(o_ref.dtype)


def _row_mean(flat, hw):
    """flat: (R, HW) -> (R,) row means via one tiled Pallas reduction (no input padding)."""
    r = flat.shape[0]
    dt = jnp.dtype(flat.dtype)
    if dt.itemsize not in _SUBLANE:
        # 8-byte dtypes have no native TPU vector path; compute the mean in f32.
        flat = flat.astype(jnp.float32)
        dt = jnp.dtype(jnp.float32)
    itemsize = dt.itemsize

    vmem_cap, num_cores = _tpu_params()
    budget = max(1 << 20, min(_MAX_BUDGET, vmem_cap // 12))   # bytes per single input buffer

    tm, thw, _ = _choose_tiles(r, hw, itemsize, budget, num_cores)
    lanes = _round_up(thw, _LANE)
    num_row_tiles = _cdiv(r, tm)
    inv_hw = 1.0 / float(hw)

    if thw == hw:
        # Single-step reduction: no accumulator, no masking, 1-D grid.
        grid = (num_row_tiles,)
        kernel = functools.partial(_row_mean_full_kernel, inv_hw=inv_hw)
        in_specs = [pl.BlockSpec((tm, hw), lambda i: (i, 0))]
        out_specs = pl.BlockSpec((tm, 1), lambda i: (i, 0))
        scratch = []
        dims = ("parallel",)
        acc_bytes = 0
    else:
        grid = (num_row_tiles, _cdiv(hw, thw))
        kernel = functools.partial(
            _row_mean_chunked_kernel,
            hw=hw, thw=thw, inv_hw=inv_hw, mask_tail=(hw % thw != 0))
        in_specs = [pl.BlockSpec((tm, thw), lambda i, j: (i, j))]
        out_specs = pl.BlockSpec((tm, 1), lambda i, j: (i, 0))
        scratch = [pltpu.VMEM((tm, _LANE), jnp.float32)]
        dims = ("parallel", "arbitrary")
        acc_bytes = tm * _LANE * 4

    # Double-buffered input + lane-padded (tm,1) output buffers + accumulator + headroom.
    vmem_limit = (2 * tm * lanes * itemsize + 2 * tm * _LANE * itemsize
                  + acc_bytes + (8 << 20))
    vmem_limit = min(int(vmem_limit), int(vmem_cap * 0.9))

    out = pl.pallas_call(
        kernel,
        out_shape=jax.ShapeDtypeStruct((r, 1), flat.dtype),
        grid_spec=pltpu.PrefetchScalarGridSpec(
            num_scalar_prefetch=0,
            grid=grid,
            in_specs=in_specs,
            out_specs=out_specs,
            scratch_shapes=scratch,
        ),
        compiler_params=pltpu.CompilerParams(
            dimension_semantics=dims,
            vmem_limit_bytes=vmem_limit,
        ),
    )(flat)
    return out[:, 0]


def single_avg_pool(single_view):
    """Global average pool of one (N, C, H, W) array -> (N, C)."""
    n, c, h, w = single_view.shape
    return _row_mean(single_view.reshape(n * c, h * w), h * w).reshape(n, c)


def all_views_avg_pool(x):
    """Mirror of AllViewsAvgPool.forward: dict of NCHW arrays -> dict of (N, C) means."""
    names = list(x.keys())
    out = {}

    # Group views sharing (flattened spatial size, dtype).  Only fuse a group into one
    # launch (via concat) when it is tiny: at real sizes the concat copy costs far more
    # HBM traffic than the few microseconds of launch overhead it saves.
    groups = {}
    for name in names:
        t = x[name]
        _, _, h, w = t.shape
        groups.setdefault((h * w, jnp.dtype(t.dtype)), []).append(name)

    for (hw, _), gnames in groups.items():
        total_bytes = sum(int(x[nm].size) * jnp.dtype(x[nm].dtype).itemsize for nm in gnames)
        if len(gnames) > 1 and total_bytes <= _FUSE_MAX_BYTES:
            rows = [x[nm].reshape(-1, hw) for nm in gnames]
            pooled = _row_mean(jnp.concatenate(rows, axis=0), hw)
            off = 0
            for nm in gnames:
                n, c, _, _ = x[nm].shape
                out[nm] = pooled[off:off + n * c].reshape(n, c)
                off += n * c
        else:
            for nm in gnames:
                n, c, _, _ = x[nm].shape
                out[nm] = _row_mean(x[nm].reshape(n * c, hw), hw).reshape(n, c)

    return {name: out[name] for name in names}


if __name__ == "__main__":
    key = jax.random.PRNGKey(0)
    view_names = ["L-CC", "R-CC", "L-MLO", "R-MLO"]
    n, c, h, w = 2, 4, 16, 16

    keys = jax.random.split(key, len(view_names))
    x = {
        name: jax.random.normal(k, (n, c, h, w), dtype=jnp.float32)
        for name, k in zip(view_names, keys)
    }

    out = all_views_avg_pool(x)
    out = jax.tree_util.tree_map(jax.block_until_ready, out)

    # sanity check against plain-JAX reference
    for name, t in x.items():
        ref = jnp.mean(t.reshape(n, c, -1), axis=-1)
        assert out[name].shape == (n, c)
        assert jnp.allclose(out[name], ref, atol=1e-5, rtol=1e-5)

    print("KERNEL_OK")
</pallas_src>

<mosaic_0001>
module attributes {stable_mosaic.version = 11 : i64} {
  func.func @_row_mean_full_kernel(%arg0: i32, %arg1: memref<32x256xf32, #tpu.memory_space<vmem>>, %arg2: memref<32x1xf32, #tpu.memory_space<vmem>>) attributes {dimension_semantics = [#tpu.dimension_semantics<parallel>], iteration_bounds = array<i64: 1>, scalar_prefetch = 0 : i64, scratch_operands = 0 : i64, tpu.core_type = #tpu.core_type<tc>, window_params = [{transform_indices = @transform_0, window_bounds = array<i64: 32, 256>}, {transform_indices = @transform_1, window_bounds = array<i64: 32, 1>}]} {
    %c0 = arith.constant 0 : index
    %c0_0 = arith.constant 0 : index
    %0 = vector.load %arg1[%c0, %c0_0] : memref<32x256xf32, #tpu.memory_space<vmem>>, vector<32x256xf32>
    %cst = arith.constant dense<0.000000e+00> : vector<32xf32>
    %1 = vector.multi_reduction <add>, %0, %cst [1] : vector<32x256xf32> to vector<32xf32>
    %2 = vector.shape_cast %1 : vector<32xf32> to vector<32x1xf32>
    %cst_1 = arith.constant 3.906250e-03 : f32
    %3 = vector.broadcast %cst_1 : f32 to vector<32x1xf32>
    %4 = arith.mulf %2, %3 : vector<32x1xf32>
    %c0_2 = arith.constant 0 : index
    %c0_3 = arith.constant 0 : index
    %5 = vector.load %arg2[%c0_2, %c0_3] : memref<32x1xf32, #tpu.memory_space<vmem>>, vector<32x1xf32>
    tpu.vector_store %arg2[%c0_2, %c0_3], %4 {strides = array<i32>} : memref<32x1xf32, #tpu.memory_space<vmem>>, vector<32x1xf32>,
    return
  }
  func.func @transform_0(%arg0: i32) -> (i32, i32) {
    %c0_i32 = arith.constant 0 : i32
    %c0_i32_0 = arith.constant 0 : i32
    return %arg0, %c0_i32 : i32, i32
  }
  func.func @transform_1(%arg0: i32) -> (i32, i32) {
    %c0_i32 = arith.constant 0 : i32
    %c0_i32_0 = arith.constant 0 : i32
    return %arg0, %c0_i32 : i32, i32
  }
}

</mosaic_0001>

<bundles_post_ra>
// kernel: tpu_custom_call.1
= control target key start
LH: loop header
LB: loop body
LE: loop exit
PB: predicated region body
PF: predicated region fallthrough
CT: control target
= control target key end

     0   :  { %6 = vsyncpa [#allocation3], 0  ;;  %s87_s9 = smov [#allocation2]   ;;  %s88_s11 = smov 256   ;;  %s115_s0 = inlined_call_operand.hbm [shape: f32[32,256], index: 0, kind: input, shape index: {}]   ;;  %s116_s1 = inlined_call_operand.vmem [shape: f32[32,1], index: 1, kind: output, shape index: {}]  }
   0x1   :  { %s11_s8 = sshll.u32 %s115_s0, 4  ;;  %s13_s10 = sshll.u32 %s87_s9, 4  ;;  %s12_s8 = int_to_ptr.hbm [resolvable:$true] %s11_s8  ;;  %s14_s10 = int_to_ptr.vmem [resolvable:$true] %s13_s10 }
   0x2   :  { %s89_s12 = smov 16  }
   0x3   :  { %19 = dma.hbm_to_vmem [thread:$0]  %s12_s8, 1024, %s14_s10, [#allocation3], %s88_s11, %s88_s11, %s89_s12  }
   0x4   :  { %85 = dma.done.wait [#allocation3], 1024  }
   0x5   :  { %86 = vsyncadd [#allocation3], 4294966272  ;;  %v28_v0 = vld [vmem:[#allocation2 + $0x20] sm:$0xff]  ;;  %v29_v1 = vld [vmem:[#allocation2 + $0x28] sm:$0xff]  ;;  %vm48_vm0 = vcmask 7168  }
   0x6   :  { %v24_v2 = vld [vmem:[#allocation2] sm:$0xff]  ;;  %v38_v3 = vadd.f32 %v29_v1, %v28_v0  ;;  %v25_v4 = vld [vmem:[#allocation2 + $0x8] sm:$0xff]  ;;  %v30_v6 = vld [vmem:[#allocation2 + $0x30] sm:$0xff] }
   0x7   :  { %v32_v5 = vadd.f32 %v25_v4, %v24_v2  ;;  %v31_v7 = vld [vmem:[#allocation2 + $0x38] sm:$0xff]  ;;  %v26_v8 = vld [vmem:[#allocation2 + $0x10] sm:$0xff] }
   0x8   :  { %39 = vadd.xlane.f32.xlu1 %v38_v3  ;;  %v27_v9 = vld [vmem:[#allocation2 + $0x18] sm:$0xff]  ;;  %v41_v10 = vadd.f32 %v31_v7, %v30_v6 }
   0x9   :  { %33 = vadd.xlane.f32.xlu0 %v32_v5  ;;  %v35_v11 = vadd.f32 %v27_v9, %v26_v8 }
  0x10   :  { %42 = vadd.xlane.f32.xlu1 %v41_v10 }
  0x11   :  { %36 = vadd.xlane.f32.xlu0 %v35_v11 }
  0x7b   :  { %v40_v12 = vpop.xlane.xlu1 %39 }
  0x7c   :  { %v46_v13 = vmul.f32 0.00390625, %v40_v12  ;;  %v34_v14 = vpop.xlane.xlu0 %33 }
  0x7d   :  { %v44_v15 = vmul.f32 0.00390625, %v34_v14 }
  0x7e   :  { %51 = vst.msk [vmem:[%s116_s1 + $0x10] sm:$0xff] %vm48_vm0, %v46_v13 }
  0x7f   :  { %49 = vst.msk [vmem:[%s116_s1] sm:$0xff] %vm48_vm0, %v44_v15 }
  0x83   :  { %v43_v16 = vpop.xlane.xlu1 %42 }
  0x84   :  { %v47_v17 = vmul.f32 0.00390625, %v43_v16  ;;  %v37_v18 = vpop.xlane.xlu0 %36 }
  0x85   :  { %v45_v19 = vmul.f32 0.00390625, %v37_v18 }
  0x86   :  { %52 = vst.msk [vmem:[%s116_s1 + $0x18] sm:$0xff] %vm48_vm0, %v47_v17 }
  0x87   :  { %50 = vst.msk [vmem:[%s116_s1 + $0x8] sm:$0xff] %vm48_vm0, %v45_v19 }
  0x88   :  { %57 = vsyncpa [#allocation3], 1 }

</bundles_post_ra>
